<compile_context>
chip_gen: v5e
topology: v5e:2x2
jax: 0.10.0
libtpu: 0.0.40
codegen_flags: <defaults>
</compile_context>

<pallas_src>
import math
import functools

import jax
import jax.numpy as jnp
from jax.experimental import pallas as pl
from jax.experimental.pallas import tpu as pltpu

_LANE = 128      # lane width -> lane-dense loads/stores
_SUBLANE = 8     # f32 sublane packing


def _round_up(n, m):
    return ((n + m - 1) // m) * m


def _make_fused_kernel(n_layers):
    """Kernel body: refs = (x, (w_i, b_i) * n_layers, out). All refs are whole VMEM tiles."""
    def kernel(*refs):
        x_ref = refs[0]
        o_ref = refs[-1]
        h = x_ref[...]
        for i in range(n_layers):
            w_ref = refs[1 + 2 * i]
            b_ref = refs[2 + 2 * i]
            # MXU matmul with f32 accumulation, then bias add + ReLU on the VPU.
            # (If layer widths / batch ever grow, cast operands to bf16 here and
            #  keep preferred_element_type=f32 for full MXU throughput on v6e/v7x.)
            h = jnp.dot(h, w_ref[...], preferred_element_type=jnp.float32)
            h = jnp.maximum(h + b_ref[...], 0.0)
            # Dropout: identity in eval mode (no-op).
        o_ref[...] = h.astype(o_ref.dtype)
    return kernel


def init_ffnn_params(key, in_features, model_params):
    """Deterministic init mirroring nn.Linear defaults (uniform +-1/sqrt(fan_in)).
    Weights stored as [in, out] (transpose of PyTorch's [out, in]); biases as (1, out)."""
    n_layers = int(model_params["n_layers"])
    params = []
    feat = in_features
    for i in range(n_layers):
        out_features = int(model_params[f"n_units_l{i}"])
        key, kw, kb = jax.random.split(key, 3)
        bound = 1.0 / math.sqrt(feat)
        w = jax.random.uniform(kw, (feat, out_features), jnp.float32,
                               minval=-bound, maxval=bound)
        b = jax.random.uniform(kb, (1, out_features), jnp.float32,
                               minval=-bound, maxval=bound)
        params.append((w, b))
        feat = out_features
    return params


def pad_ffnn_params(params, in_features):
    """Zero-pad every layer's in/out dims up to multiples of 128 lanes (numerically exact)."""
    padded = []
    feat_p = _round_up(in_features, _LANE)
    for (w, b) in params:
        k, n = w.shape
        n_p = _round_up(n, _LANE)
        w_p = jnp.zeros((feat_p, n_p), w.dtype).at[:k, :n].set(w)
        b_p = jnp.zeros((1, n_p), b.dtype).at[:, :n].set(b)
        padded.append((w_p, b_p))
        feat_p = n_p
    return padded


@functools.partial(jax.jit, static_argnames=("out_features",))
def ffnn_pre_notrain_forward(x, padded_params, out_features):
    """Forward pass: (Linear -> ReLU -> Dropout[eval=identity]) * n_layers, one fused kernel."""
    n_layers = len(padded_params)
    m, k = x.shape
    m_p = _round_up(m, _SUBLANE)
    k_p = padded_params[0][0].shape[0]
    n_p = padded_params[-1][0].shape[1]

    # Zero-pad the activation to a sublane/lane-aligned tile.
    x_p = jnp.zeros((m_p, k_p), x.dtype).at[:m, :k].set(x)

    vmem = pl.BlockSpec(memory_space=pltpu.MemorySpace.VMEM)

    flat_args = [x_p]
    for (w_p, b_p) in padded_params:
        flat_args.append(w_p)
        flat_args.append(b_p)

    out_p = pl.pallas_call(
        _make_fused_kernel(n_layers),
        out_shape=jax.ShapeDtypeStruct((m_p, n_p), x.dtype),
        in_specs=[vmem] * len(flat_args),
        out_specs=vmem,
    )(*flat_args)

    # User-visible (unpadded) slice.
    return out_p[:m, :out_features]


if __name__ == "__main__":
    key = jax.random.PRNGKey(0)

    in_features = 32
    model_params = {
        "n_layers": 2,
        "n_units_l0": 64,
        "dropout_l0": 0.1,
        "n_units_l1": 16,
        "dropout_l1": 0.2,
    }

    kx, kp = jax.random.split(key)
    batch = 8
    x = jax.random.normal(kx, (batch, in_features), jnp.float32)

    params = init_ffnn_params(kp, in_features, model_params)
    padded_params = pad_ffnn_params(params, in_features)
    out_features = int(model_params[f"n_units_l{int(model_params['n_layers']) - 1}"])

    out = ffnn_pre_notrain_forward(x, padded_params, out_features)
    out = jax.block_until_ready(out)

    # sanity: correct shape and ReLU non-negativity
    assert out.shape == (batch, out_features)
    assert bool(jnp.all(out >= 0.0))

    # reference check against plain JAX (unpadded params)
    ref = x
    for (w, b) in params:
        ref = jnp.maximum(ref @ w + b, 0.0)
    assert bool(jnp.allclose(out, ref, atol=1e-5, rtol=1e-5))

    print("KERNEL_OK")
</pallas_src>

<mosaic_0001>
module attributes {stable_mosaic.version = 11 : i64} {
  func.func @kernel(%arg0: memref<8x128xf32, #tpu.memory_space<vmem>>, %arg1: memref<128x128xf32, #tpu.memory_space<vmem>>, %arg2: memref<1x128xf32, #tpu.memory_space<vmem>>, %arg3: memref<128x128xf32, #tpu.memory_space<vmem>>, %arg4: memref<1x128xf32, #tpu.memory_space<vmem>>, %arg5: memref<8x128xf32, #tpu.memory_space<vmem>>) attributes {dimension_semantics = [], scalar_prefetch = 0 : i64, scratch_operands = 0 : i64, tpu.core_type = #tpu.core_type<tc>} {
    %c0 = arith.constant 0 : index
    %c0_0 = arith.constant 0 : index
    %0 = vector.load %arg0[%c0, %c0_0] : memref<8x128xf32, #tpu.memory_space<vmem>>, vector<8x128xf32>
    %c0_1 = arith.constant 0 : index
    %c0_2 = arith.constant 0 : index
    %1 = vector.load %arg1[%c0_1, %c0_2] : memref<128x128xf32, #tpu.memory_space<vmem>>, vector<128x128xf32>
    %cst = arith.constant dense<0.000000e+00> : vector<8x128xf32>
    %2 = tpu.matmul %0, %1, %cst {dimension_numbers = #tpu.dot_dimension_numbers<[1], [0], [0], [1], [0, 0, 1, 1], [], []>} : vector<8x128xf32>, vector<128x128xf32>, vector<8x128xf32> -> vector<8x128xf32>
    %c0_3 = arith.constant 0 : index
    %c0_4 = arith.constant 0 : index
    %3 = vector.load %arg2[%c0_3, %c0_4] : memref<1x128xf32, #tpu.memory_space<vmem>>, vector<1x128xf32>
    %4 = vector.broadcast %3 : vector<1x128xf32> to vector<8x128xf32>
    %5 = arith.addf %2, %4 : vector<8x128xf32>
    %cst_5 = arith.constant 0.000000e+00 : f32
    %6 = vector.broadcast %cst_5 : f32 to vector<8x128xf32>
    %7 = arith.maximumf %5, %6 : vector<8x128xf32>
    %c0_6 = arith.constant 0 : index
    %c0_7 = arith.constant 0 : index
    %8 = vector.load %arg3[%c0_6, %c0_7] : memref<128x128xf32, #tpu.memory_space<vmem>>, vector<128x128xf32>
    %cst_8 = arith.constant dense<0.000000e+00> : vector<8x128xf32>
    %9 = tpu.matmul %7, %8, %cst_8 {dimension_numbers = #tpu.dot_dimension_numbers<[1], [0], [0], [1], [0, 0, 1, 1], [], []>} : vector<8x128xf32>, vector<128x128xf32>, vector<8x128xf32> -> vector<8x128xf32>
    %c0_9 = arith.constant 0 : index
    %c0_10 = arith.constant 0 : index
    %10 = vector.load %arg4[%c0_9, %c0_10] : memref<1x128xf32, #tpu.memory_space<vmem>>, vector<1x128xf32>
    %11 = vector.broadcast %10 : vector<1x128xf32> to vector<8x128xf32>
    %12 = arith.addf %9, %11 : vector<8x128xf32>
    %cst_11 = arith.constant 0.000000e+00 : f32
    %13 = vector.broadcast %cst_11 : f32 to vector<8x128xf32>
    %14 = arith.maximumf %12, %13 : vector<8x128xf32>
    %c0_12 = arith.constant 0 : index
    %c0_13 = arith.constant 0 : index
    %15 = vector.load %arg5[%c0_12, %c0_13] : memref<8x128xf32, #tpu.memory_space<vmem>>, vector<8x128xf32>
    tpu.vector_store %arg5[%c0_12, %c0_13], %14 {strides = array<i32>} : memref<8x128xf32, #tpu.memory_space<vmem>>, vector<8x128xf32>,
    return
  }
}

</mosaic_0001>

<bundles_post_ra>
// kernel: ffnn_pre_notrain_forward.1
= control target key start
LH: loop header
LB: loop body
LE: loop exit
PB: predicated region body
PF: predicated region fallthrough
CT: control target
= control target key end

     0   :  { %10 = vsyncpa [#allocation3], 0  ;;  %s293_s0 = inlined_call_operand.vmem [shape: f32[8,128], index: 0, kind: input, shape index: {}]   ;;  %s294_s1 = inlined_call_operand.hbm [shape: f32[128,128], index: 1, kind: input, shape index: {}]   ;;  %s295_s2 = inlined_call_operand.vmem [shape: f32[1,128], index: 2, kind: input, shape index: {}]   ;;  %s296_s3 = inlined_call_operand.hbm [shape: f32[128,128], index: 3, kind: input, shape index: {}]   ;;  %s297_s4 = inlined_call_operand.vmem [shape: f32[1,128], index: 4, kind: input, shape index: {}]   ;;  %s298_s5 = inlined_call_operand.hbm [shape: f32[8,128], index: 5, kind: output, shape index: {}]  }
   0x1   :  { %11 = vsyncpa [#allocation6], 0 }
   0x2   :  { %12 = vsyncpa [#allocation4], 0  ;;  %s19_s20 = sshll.u32 %s294_s1, 4  ;;  %s240_s21 = smov [#allocation2]   ;;  %s20_s20 = int_to_ptr.hbm [resolvable:$true] %s19_s20 }
   0x3   :  { %s21_s22 = sshll.u32 %s240_s21, 4  ;;  %s34_s25 = sshll.u32 %s296_s3, 4  ;;  %s22_s22 = int_to_ptr.vmem [resolvable:$true] %s21_s22  ;;  %s35_s25 = int_to_ptr.hbm [resolvable:$true] %s34_s25 }
   0x4   :  { %s241_s26 = smov 128   ;;  %s242_s27 = smov 8  }
   0x5   :  { %27 = dma.hbm_to_vmem [thread:$0]  %s20_s20, 2048, %s22_s22, [#allocation3], %s241_s26, %s241_s26, %s242_s27  }
   0x6   :  { %s243_s28 = smov [#allocation5]  }
   0x7   :  { %s36_s29 = sshll.u32 %s243_s28, 4  ;;  %s37_s29 = int_to_ptr.vmem [resolvable:$true] %s36_s29 }
   0x8   :  { %42 = dma.hbm_to_vmem [thread:$0]  %s35_s25, 2048, %s37_s29, [#allocation6], %s241_s26, %s241_s26, %s242_s27  }
   0x9   :  { %234 = dma.done.wait [#allocation3], 2048  }
   0xa   :  { %235 = vsyncadd [#allocation3], 4294965248 }
   0xb   :  { %236 = dma.done.wait [#allocation6], 2048  }
   0xc   :  { %237 = vsyncadd [#allocation6], 4294965248  ;;  %v69_v0 = vld [vmem:[#allocation2 + $0x78] sm:$0xff]  ;;  %v68_v1 = vld [vmem:[#allocation2 + $0x70] sm:$0xff]  ;;  %s144_s12 = sshll.u32 %s298_s5, 4  ;;  %s145_s12 = int_to_ptr.hbm [resolvable:$true] %s144_s12 }
   0xd   :  { %74 = vmatpush.msra.mxu0 %v69_v0  ;;  %v67_v2 = vld [vmem:[#allocation2 + $0x68] sm:$0xff]  ;;  %v66_v3 = vld [vmem:[#allocation2 + $0x60] sm:$0xff]  ;;  %v110_v4 = vld [vmem:[#allocation5 + $0x78] sm:$0xff] }
   0xe   :  { %v65_v5 = vld [vmem:[#allocation2 + $0x58] sm:$0xff]  ;;  %115 = vmatpush.msra.mxu1 %v110_v4  ;;  %v109_v6 = vld [vmem:[#allocation5 + $0x70] sm:$0xff]  ;;  %v108_v7 = vld [vmem:[#allocation5 + $0x68] sm:$0xff] }
   0xf   :  { %75 = vmatpush.msra.mxu0 %v68_v1  ;;  %v64_v8 = vld [vmem:[#allocation2 + $0x50] sm:$0xff]  ;;  %v107_v9 = vld [vmem:[#allocation5 + $0x60] sm:$0xff]  ;;  %v63_v10 = vld [vmem:[#allocation2 + $0x48] sm:$0xff] }
  0x10   :  { %116 = vmatpush.msra.mxu1 %v109_v6  ;;  %v106_v11 = vld [vmem:[#allocation5 + $0x58] sm:$0xff]  ;;  %v62_v12 = vld [vmem:[#allocation2 + $0x40] sm:$0xff]  ;;  %v105_v13 = vld [vmem:[#allocation5 + $0x50] sm:$0xff] }
  0x11   :  { %76 = vmatpush.msra.mxu0 %v67_v2  ;;  %v61_v14 = vld [vmem:[#allocation2 + $0x38] sm:$0xff]  ;;  %v104_v15 = vld [vmem:[#allocation5 + $0x48] sm:$0xff]  ;;  %v60_v16 = vld [vmem:[#allocation2 + $0x30] sm:$0xff] }
  0x12   :  { %117 = vmatpush.msra.mxu1 %v108_v7  ;;  %v103_v17 = vld [vmem:[#allocation5 + $0x40] sm:$0xff]  ;;  %v59_v18 = vld [vmem:[#allocation2 + $0x28] sm:$0xff]  ;;  %v102_v19 = vld [vmem:[#allocation5 + $0x38] sm:$0xff] }
  0x13   :  { %77 = vmatpush.msra.mxu0 %v66_v3  ;;  %v58_v20 = vld [vmem:[#allocation2 + $0x20] sm:$0xff]  ;;  %v101_v21 = vld [vmem:[#allocation5 + $0x30] sm:$0xff]  ;;  %v57_v22 = vld [vmem:[#allocation2 + $0x18] sm:$0xff] }
  0x14   :  { %118 = vmatpush.msra.mxu1 %v107_v9  ;;  %v100_v23 = vld [vmem:[#allocation5 + $0x28] sm:$0xff]  ;;  %v56_v24 = vld [vmem:[#allocation2 + $0x10] sm:$0xff]  ;;  %v99_v25 = vld [vmem:[#allocation5 + $0x20] sm:$0xff] }
  0x15   :  { %78 = vmatpush.msra.mxu0 %v65_v5  ;;  %v55_v26 = vld [vmem:[#allocation2 + $0x8] sm:$0xff]  ;;  %v98_v27 = vld [vmem:[#allocation5 + $0x18] sm:$0xff]  ;;  %v54_v28 = vld [vmem:[#allocation2] sm:$0xff] }
  0x16   :  { %119 = vmatpush.msra.mxu1 %v106_v11  ;;  %v53_v29 = vld [vmem:[%s293_s0] sm:$0xff]  ;;  %v97_v30 = vld [vmem:[#allocation5 + $0x10] sm:$0xff]  ;;  %v96_v31 = vld [vmem:[#allocation5 + $0x8] sm:$0xff]  ;;  %s244_s0 = smov [#allocation7]  }
  0x17   :  { %79 = vmatpush.msra.mxu0 %v64_v8  ;;  %v95_v32 = vld [vmem:[#allocation5] sm:$0xff]  ;;  %s142_s9 = sshll.u32 %s244_s0, 4  ;;  %s143_s9 = int_to_ptr.vmem [resolvable:$true] %s142_s9 }
  0x18   :  { %120 = vmatpush.msra.mxu1 %v105_v13  ;;  %v160_v33 = vld [vmem:[%s295_s2] ss:$0 sm:$0xff] }
  0x19   :  { %80 = vmatpush.msra.mxu0 %v63_v10  ;;  %v161_v37 = vld [vmem:[%s297_s4] ss:$0 sm:$0xff] }
  0x1a   :  { %121 = vmatpush.msra.mxu1 %v104_v15 }
  0x1b   :  { %81 = vmatpush.msra.mxu0 %v62_v12 }
  0x1c   :  { %122 = vmatpush.msra.mxu1 %v103_v17 }
  0x1d   :  { %82 = vmatpush.msra.mxu0 %v61_v14 }
  0x1e   :  { %123 = vmatpush.msra.mxu1 %v102_v19 }
  0x1f   :  { %83 = vmatpush.msra.mxu0 %v60_v16 }
  0x20   :  { %124 = vmatpush.msra.mxu1 %v101_v21 }
  0x21   :  { %84 = vmatpush.msra.mxu0 %v59_v18 }
  0x22   :  { %125 = vmatpush.msra.mxu1 %v100_v23 }
  0x23   :  { %85 = vmatpush.msra.mxu0 %v58_v20 }
  0x24   :  { %126 = vmatpush.msra.mxu1 %v99_v25 }
  0x25   :  { %86 = vmatpush.msra.mxu0 %v57_v22 }
  0x26   :  { %127 = vmatpush.msra.mxu1 %v98_v27 }
  0x27   :  { %87 = vmatpush.msra.mxu0 %v56_v24 }
  0x28   :  { %128 = vmatpush.msra.mxu1 %v97_v30 }
  0x29   :  { %88 = vmatpush.msra.mxu0 %v55_v26 }
  0x2a   :  { %129 = vmatpush.msra.mxu1 %v96_v31 }
  0x2b   :  { %89 = vmatpush.msra.mxu0 %v54_v28 }
  0x2c   :  { %90 = vmatmul.f32.vlgmr.msra.gmra.mxu0 %v53_v29  ;;  %130 = vmatpush.msra.mxu1 %v95_v32 }
  0xa9   :  { %v91_v34 = vpop.f32.mrf.mxu0 }
  0xaa   :  { %v92_v35 = vadd.f32 %v160_v33, %v91_v34 }
  0xac   :  { %v94_v36 = vmax.f32 %v92_v35, 0.0 }
  0xae   :  { %131 = vmatmul.f32.vlgmr.msra.gmra.mxu1 %v94_v36 }
 0x12b   :  { %v132_v38 = vpop.f32.mrf.mxu1 }
 0x12c   :  { %v133_v39 = vadd.f32 %v161_v37, %v132_v38 }
 0x12e   :  { %v135_v40 = vmax.f32 %v133_v39, 0.0 }
 0x130   :  { %136 = vst [vmem:[#allocation7] sm:$0xff] %v135_v40 }
 0x131   :  { %147 = dma.vmem_to_hbm [thread:$0]  %s143_s9, 128, %s145_s12, [#allocation4]  }
 0x132   :  { %238 = dma.done.wait [#allocation4], 128  }
 0x133   :  { %239 = vsyncadd [#allocation4], 4294967168 }
 0x134   :  { %152 = vsyncpa [#allocation3], 1 }
 0x135   :  { %153 = vsyncpa [#allocation6], 1 }
 0x136   :  { %154 = vsyncpa [#allocation4], 1 }

</bundles_post_ra>
